<compile_context>
chip_gen: v5e
topology: v5e:2x2
jax: 0.10.0
libtpu: 0.0.40
codegen_flags: <defaults>
</compile_context>

<pallas_src>
import functools
import math

import jax
import jax.numpy as jnp
from jax.experimental import pallas as pl
from jax.experimental.pallas import tpu as pltpu


def _cdiv(a, b):
    return -(-a // b)


def _round_up(a, m):
    return _cdiv(a, m) * m


# ----------------------------------------------------------------------------
# Pallas kernels
# ----------------------------------------------------------------------------
def _mm_bias_act_kernel(x_ref, w_ref, b_ref, o_ref, acc_ref, *, act):
    """acc += X @ W over the K grid axis; last K step: out = act(acc + bias).

    BN scale is folded into W at build time, so the epilogue is add(+ReLU).
    """
    @pl.when(pl.program_id(2) == 0)
    def _():
        acc_ref[...] = jnp.zeros_like(acc_ref)

    acc_ref[...] += jnp.dot(x_ref[...], w_ref[...],
                            preferred_element_type=jnp.float32)

    @pl.when(pl.program_id(2) == pl.num_programs(2) - 1)
    def _():
        y = acc_ref[...] + b_ref[...]
        if act == "relu":
            y = jnp.maximum(y, 0.0)
        o_ref[...] = y.astype(o_ref.dtype)


def _pool3x3_kernel(x_ref, o_ref, *, op, stride):
    """3x3 'valid' pooling on a (1, Hin, Win, Cblk) VMEM tile.

    Separable 1x3 (W) then 3x1 (H) reduction; the stride-`stride` subsample is
    folded in (strided pl.ds reads along W, strided leading-dim slices along H).
    avg accumulates in f32 with count_include_pad=True semantics (/9).
    """
    ho, wo = o_ref.shape[1], o_ref.shape[2]
    red = jnp.maximum if op == "max" else (lambda a, b: a + b)

    if stride == 1:
        x = x_ref[...]
        if op == "avg":
            x = x.astype(jnp.float32)
        r = red(red(x[:, :, 0:wo, :], x[:, :, 1:1 + wo, :]), x[:, :, 2:2 + wo, :])
        out = red(red(r[:, 0:ho, :, :], r[:, 1:1 + ho, :, :]),
                  r[:, 2:2 + ho, :, :])
    else:
        def wtap(j):
            v = x_ref[:, :, pl.ds(j, wo, stride=stride), :]
            return v.astype(jnp.float32) if op == "avg" else v

        r = red(red(wtap(0), wtap(1)), wtap(2))
        hspan = (ho - 1) * stride + 1
        out = red(red(r[:, 0:hspan:stride, :, :],
                      r[:, 1:1 + hspan:stride, :, :]),
                  r[:, 2:2 + hspan:stride, :, :])

    if op == "avg":
        out = out * (1.0 / 9.0)
    o_ref[...] = out.astype(o_ref.dtype)


def _gap_fc_sigmoid_kernel(x_ref, wt_ref, b_ref, o_ref):
    """Global average pool over (H, W) + Linear(2048 -> 1) + Sigmoid, fused."""
    x = x_ref[...].astype(jnp.float32)                  # (N, H, W, C)
    hw = x.shape[1] * x.shape[2]
    pooled = jnp.mean(x, axis=(1, 2)) * (x.shape[1] * x.shape[2] / hw)  # (N, C)
    w = wt_ref[...].astype(jnp.float32)                 # (1, C)
    y = jnp.sum(pooled * w, axis=-1, keepdims=True) + b_ref[...]
    o_ref[...] = jax.nn.sigmoid(y).astype(o_ref.dtype)


# ----------------------------------------------------------------------------
# Tile selection helpers
# ----------------------------------------------------------------------------
def _pick_tm(M):
    cands = (512, 448, 384, 320, 256, 192, 128)
    for t in cands:                                   # largest with <=12.5% waste
        padded = _round_up(M, t)
        if (padded - M) / padded <= 0.125:
            return t
    return min(cands, key=lambda t: (_round_up(M, t) - M, -t))


def _pick_tn(Np, grid_m):
    cands = [t for t in (512, 384, 256, 128) if Np % t == 0]
    if grid_m == 1:
        multi = [t for t in cands if Np // t >= 2]    # >=2 N steps for v7x 2xTC
        if multi:
            return multi[0]
    return cands[0]


def _pick_tk(Kp):
    if Kp % 128 == 0:
        return max(t for t in range(128, min(Kp, 512) + 1, 128) if Kp % t == 0)
    return Kp                                         # K % 8 == 0 (full-dim block)


# ----------------------------------------------------------------------------
# Pallas wrappers
# ----------------------------------------------------------------------------
@functools.partial(jax.jit, static_argnames=("n_out", "act"))
def matmul_bias_act(x, w, bias, *, n_out, act="relu"):
    """act((x @ w) + bias); w (Kp, Np) / bias (1, Np) are pre-packed.

    M and N are NOT padded: grid_m = cdiv(M, tm) with masked edge blocks and
    the output is written at its exact (M, n_out) shape.
    """
    M, Kx = x.shape
    Kp, Np = w.shape
    assert Kx == Kp, (Kx, Kp)

    tm = _pick_tm(M)
    grid_m = _cdiv(M, tm)
    tn = _pick_tn(Np, grid_m)
    tk = _pick_tk(Kp)
    grid = (grid_m, Np // tn, Kp // tk)

    est = 2 * ((tm * tk + tk * tn) * 2 + tm * tn * 2 + tn * 4) + tm * tn * 4
    vmem = int(min(max(2 * est, 32 << 20), 56 << 20))

    out = pl.pallas_call(
        functools.partial(_mm_bias_act_kernel, act=act),
        out_shape=jax.ShapeDtypeStruct((M, n_out), jnp.bfloat16),
        grid_spec=pltpu.PrefetchScalarGridSpec(
            num_scalar_prefetch=0,
            grid=grid,
            in_specs=[
                pl.BlockSpec((tm, tk), lambda i, j, k: (i, k)),
                pl.BlockSpec((tk, tn), lambda i, j, k: (k, j)),
                pl.BlockSpec((1, tn), lambda i, j, k: (0, j)),
            ],
            out_specs=pl.BlockSpec((tm, tn), lambda i, j, k: (i, j)),
            scratch_shapes=[pltpu.VMEM((tm, tn), jnp.float32)],
        ),
        compiler_params=pltpu.CompilerParams(
            dimension_semantics=("parallel", "parallel", "arbitrary"),
            vmem_limit_bytes=vmem),
    )(x.astype(jnp.bfloat16), w, bias)
    return out                                        # (M, n_out), bf16


@functools.partial(jax.jit, static_argnames=("op", "stride", "padding"))
def pool3x3(x, *, op, stride, padding):
    """3x3 max/avg pool, NHWC, stride folded into the kernel."""
    if padding:
        cval = -jnp.inf if op == "max" else 0.0
        x = jnp.pad(x, ((0, 0), (padding, padding), (padding, padding), (0, 0)),
                    constant_values=cval)
    n, h, w, c = x.shape
    ho = (h - 3) // stride + 1
    wo = (w - 3) // stride + 1
    tc = 128 if c % 128 == 0 else c

    est = 2 * (h * w * tc + ho * wo * tc) * x.dtype.itemsize
    vmem = int(min(max(2 * est, 32 << 20), 56 << 20))

    return pl.pallas_call(
        functools.partial(_pool3x3_kernel, op=op, stride=stride),
        out_shape=jax.ShapeDtypeStruct((n, ho, wo, c), x.dtype),
        grid_spec=pltpu.PrefetchScalarGridSpec(
            num_scalar_prefetch=0,
            grid=(n, c // tc),
            in_specs=[pl.BlockSpec((1, h, w, tc), lambda b, cb: (b, 0, 0, cb))],
            out_specs=pl.BlockSpec((1, ho, wo, tc), lambda b, cb: (b, 0, 0, cb)),
        ),
        compiler_params=pltpu.CompilerParams(
            dimension_semantics=("parallel", "parallel"),
            vmem_limit_bytes=vmem),
    )(x)


@jax.jit
def gap_fc_sigmoid(x, w_t, b):
    n = x.shape[0]
    return pl.pallas_call(
        _gap_fc_sigmoid_kernel,
        out_shape=jax.ShapeDtypeStruct((n, 1), jnp.float32),
    )(x, w_t, b)


# ----------------------------------------------------------------------------
# Conv (+folded-BN+ReLU) = im2col glue + Pallas fused matmul
# ----------------------------------------------------------------------------
def conv_bn_relu(x, p, stride=(1, 1), padding=(0, 0)):
    """BasicConv2d: Conv2d(bias=False) + BatchNorm(eps=1e-3) + ReLU (NHWC)."""
    kh, kw = p["kh"], p["kw"]
    sh, sw = stride
    ph, pw = padding
    if ph or pw:
        x = jnp.pad(x, ((0, 0), (ph, ph), (pw, pw), (0, 0)))
    n, hp, wp, c = x.shape
    ho = (hp - kh) // sh + 1
    wo = (wp - kw) // sw + 1
    if kh == 1 and kw == 1 and sh == 1 and sw == 1:
        lhs = x.reshape(n * ho * wo, c)                    # pure matmul, no im2col
    else:
        # TODO(synk): fuse im2col into the matmul K-loop (stream shifted NHWC
        # windows via element-offset index_maps or manual DMA) instead of
        # materializing it with XLA glue.
        cols = [x[:, i:i + sh * (ho - 1) + 1:sh, j:j + sw * (wo - 1) + 1:sw, :]
                for i in range(kh) for j in range(kw)]
        lhs = jnp.concatenate(cols, axis=-1).reshape(n * ho * wo, kh * kw * c)
    Kp = p["w"].shape[0]
    if lhs.shape[1] != Kp:                                 # rare (stem conv, 4032)
        lhs = jnp.pad(lhs, ((0, 0), (0, Kp - lhs.shape[1])))
    out = matmul_bias_act(lhs, p["w"], p["bias"], n_out=p["N"], act="relu")
    return out.reshape(n, ho, wo, p["N"])


def conv_heads_1x1(x, fused):
    """Several 1x1 BasicConv2d sharing the same input, as ONE matmul."""
    n, h, w, c = x.shape
    lhs = x.reshape(n * h * w, c)
    Kp = fused["w"].shape[0]
    if lhs.shape[1] != Kp:
        lhs = jnp.pad(lhs, ((0, 0), (0, Kp - lhs.shape[1])))
    out = matmul_bias_act(lhs, fused["w"], fused["bias"],
                          n_out=fused["N"], act="relu")
    outs, start = [], 0
    for width in fused["splits"]:
        outs.append(out[:, start:start + width].reshape(n, h, w, width))
        start += width
    return outs


# ----------------------------------------------------------------------------
# Deterministic parameter construction (shapes follow torchvision Inception V3)
# ----------------------------------------------------------------------------
class ParamGen:
    def __init__(self, seed=0):
        self._key = jax.random.PRNGKey(seed)
        self._i = 0

    def next(self):
        self._i += 1
        return jax.random.fold_in(self._key, self._i)


def make_basic_conv(pg, cin, cout, kh, kw):
    fan_in = cin * kh * kw
    w = jax.random.normal(pg.next(), (cout, cin, kh, kw), jnp.float32)
    w = w * (1.0 / math.sqrt(fan_in))
    gamma = jax.random.uniform(pg.next(), (cout,), jnp.float32, 0.8, 1.2)
    beta = jax.random.normal(pg.next(), (cout,), jnp.float32) * 0.05
    rmean = jax.random.normal(pg.next(), (cout,), jnp.float32) * 0.05
    rvar = jax.random.uniform(pg.next(), (cout,), jnp.float32, 0.8, 1.2)
    eps = 1e-3
    scale = gamma / jnp.sqrt(rvar + eps)
    bias = beta - rmean * scale
    wmat = jnp.transpose(w, (2, 3, 1, 0)).reshape(kh * kw * cin, cout)
    return dict(wmat=wmat, scale=scale, bias=bias, kh=kh, kw=kw, cout=cout)


def _k_pad_target(K):
    if K % 128 == 0:
        return K
    if K % 8 == 0 and K <= 2048:
        return K                        # full-K single block, no LHS pad needed
    return _round_up(K, 128)


def pack_conv(raw):
    """Fold BN scale into the weights, pad to MXU-friendly shapes, cast bf16."""
    K, N = raw["wmat"].shape
    Kp = _k_pad_target(K)
    Np = _round_up(N, 128)
    w = raw["wmat"] * raw["scale"][None, :]            # BN folding in f32
    w = jnp.pad(w, ((0, Kp - K), (0, Np - N))).astype(jnp.bfloat16)
    bias = jnp.pad(raw["bias"], (0, Np - N)).reshape(1, Np).astype(jnp.float32)
    return dict(w=w, bias=bias, kh=raw["kh"], kw=raw["kw"], N=N)


def fuse_1x1(raws):
    """Fuse sibling 1x1 convs (same input) along the N dimension."""
    wmat = jnp.concatenate([r["wmat"] for r in raws], axis=1)
    scale = jnp.concatenate([r["scale"] for r in raws])
    bias = jnp.concatenate([r["bias"] for r in raws])
    fused = pack_conv(dict(wmat=wmat, scale=scale, bias=bias, kh=1, kw=1))
    fused["splits"] = tuple(int(r["cout"]) for r in raws)
    return fused


def make_inception_a(pg, cin, pool_features):
    b1 = make_basic_conv(pg, cin, 64, 1, 1)
    b5_1 = make_basic_conv(pg, cin, 48, 1, 1)
    b3d_1 = make_basic_conv(pg, cin, 64, 1, 1)
    return dict(
        head=fuse_1x1([b1, b5_1, b3d_1]),
        b5_2=pack_conv(make_basic_conv(pg, 48, 64, 5, 5)),
        b3d_2=pack_conv(make_basic_conv(pg, 64, 96, 3, 3)),
        b3d_3=pack_conv(make_basic_conv(pg, 96, 96, 3, 3)),
        bp=pack_conv(make_basic_conv(pg, cin, pool_features, 1, 1)),
    )


def make_inception_b(pg, cin):
    return dict(
        b3=pack_conv(make_basic_conv(pg, cin, 384, 3, 3)),
        b3d_1=pack_conv(make_basic_conv(pg, cin, 64, 1, 1)),
        b3d_2=pack_conv(make_basic_conv(pg, 64, 96, 3, 3)),
        b3d_3=pack_conv(make_basic_conv(pg, 96, 96, 3, 3)),
    )


def make_inception_c(pg, cin, c7):
    b1 = make_basic_conv(pg, cin, 192, 1, 1)
    b7_1 = make_basic_conv(pg, cin, c7, 1, 1)
    b7d_1 = make_basic_conv(pg, cin, c7, 1, 1)
    return dict(
        head=fuse_1x1([b1, b7_1, b7d_1]),
        b7_2=pack_conv(make_basic_conv(pg, c7, c7, 1, 7)),
        b7_3=pack_conv(make_basic_conv(pg, c7, 192, 7, 1)),
        b7d_2=pack_conv(make_basic_conv(pg, c7, c7, 7, 1)),
        b7d_3=pack_conv(make_basic_conv(pg, c7, c7, 1, 7)),
        b7d_4=pack_conv(make_basic_conv(pg, c7, c7, 7, 1)),
        b7d_5=pack_conv(make_basic_conv(pg, c7, 192, 1, 7)),
        bp=pack_conv(make_basic_conv(pg, cin, 192, 1, 1)),
    )


def make_inception_d(pg, cin):
    b3_1 = make_basic_conv(pg, cin, 192, 1, 1)
    b7_1 = make_basic_conv(pg, cin, 192, 1, 1)
    return dict(
        head=fuse_1x1([b3_1, b7_1]),
        b3_2=pack_conv(make_basic_conv(pg, 192, 320, 3, 3)),
        b7_2=pack_conv(make_basic_conv(pg, 192, 192, 1, 7)),
        b7_3=pack_conv(make_basic_conv(pg, 192, 192, 7, 1)),
        b7_4=pack_conv(make_basic_conv(pg, 192, 192, 3, 3)),
    )


def make_inception_e(pg, cin):
    b1 = make_basic_conv(pg, cin, 320, 1, 1)
    b3_1 = make_basic_conv(pg, cin, 384, 1, 1)
    b3d_1 = make_basic_conv(pg, cin, 448, 1, 1)
    return dict(
        head=fuse_1x1([b1, b3_1, b3d_1]),
        b3_2a=pack_conv(make_basic_conv(pg, 384, 384, 1, 3)),
        b3_2b=pack_conv(make_basic_conv(pg, 384, 384, 3, 1)),
        b3d_2=pack_conv(make_basic_conv(pg, 448, 384, 3, 3)),
        b3d_3a=pack_conv(make_basic_conv(pg, 384, 384, 1, 3)),
        b3d_3b=pack_conv(make_basic_conv(pg, 384, 384, 3, 1)),
        bp=pack_conv(make_basic_conv(pg, cin, 192, 1, 1)),
    )


def make_inception_v3(pg):
    P = {}
    P["c1a"] = pack_conv(make_basic_conv(pg, 3, 32, 3, 3))
    P["c2a"] = pack_conv(make_basic_conv(pg, 32, 32, 3, 3))
    P["c2b"] = pack_conv(make_basic_conv(pg, 32, 64, 3, 3))
    P["c3b"] = pack_conv(make_basic_conv(pg, 64, 80, 1, 1))
    P["c4a"] = pack_conv(make_basic_conv(pg, 80, 192, 3, 3))
    P["m5b"] = make_inception_a(pg, 192, 32)
    P["m5c"] = make_inception_a(pg, 256, 64)
    P["m5d"] = make_inception_a(pg, 288, 64)
    P["m6a"] = make_inception_b(pg, 288)
    P["m6b"] = make_inception_c(pg, 768, 128)
    P["m6c"] = make_inception_c(pg, 768, 160)
    P["m6d"] = make_inception_c(pg, 768, 160)
    P["m6e"] = make_inception_c(pg, 768, 192)
    P["m7a"] = make_inception_d(pg, 768)
    P["m7b"] = make_inception_e(pg, 1280)
    P["m7c"] = make_inception_e(pg, 2048)
    fc_w = jax.random.normal(pg.next(), (2048, 1), jnp.float32) * 0.02
    P["fc_wt"] = fc_w.T                                     # (1, 2048)
    P["fc_b"] = (jax.random.normal(pg.next(), (1,), jnp.float32) * 0.02
                 ).reshape(1, 1)
    return P


# ----------------------------------------------------------------------------
# Inception blocks (branch concat order matches torchvision)
# ----------------------------------------------------------------------------
def inception_a(x, p):
    b1, b5, bd = conv_heads_1x1(x, p["head"])
    b5 = conv_bn_relu(b5, p["b5_2"], padding=(2, 2))
    bd = conv_bn_relu(bd, p["b3d_2"], padding=(1, 1))
    bd = conv_bn_relu(bd, p["b3d_3"], padding=(1, 1))
    bp = pool3x3(x, op="avg", stride=1, padding=1)
    bp = conv_bn_relu(bp, p["bp"])
    return jnp.concatenate([b1, b5, bd, bp], axis=-1)


def inception_b(x, p):
    b3 = conv_bn_relu(x, p["b3"], stride=(2, 2))
    bd = conv_bn_relu(x, p["b3d_1"])
    bd = conv_bn_relu(bd, p["b3d_2"], padding=(1, 1))
    bd = conv_bn_relu(bd, p["b3d_3"], stride=(2, 2))
    bp = pool3x3(x, op="max", stride=2, padding=0)
    return jnp.concatenate([b3, bd, bp], axis=-1)


def inception_c(x, p):
    b1, b7, bd = conv_heads_1x1(x, p["head"])
    b7 = conv_bn_relu(b7, p["b7_2"], padding=(0, 3))
    b7 = conv_bn_relu(b7, p["b7_3"], padding=(3, 0))
    bd = conv_bn_relu(bd, p["b7d_2"], padding=(3, 0))
    bd = conv_bn_relu(bd, p["b7d_3"], padding=(0, 3))
    bd = conv_bn_relu(bd, p["b7d_4"], padding=(3, 0))
    bd = conv_bn_relu(bd, p["b7d_5"], padding=(0, 3))
    bp = pool3x3(x, op="avg", stride=1, padding=1)
    bp = conv_bn_relu(bp, p["bp"])
    return jnp.concatenate([b1, b7, bd, bp], axis=-1)


def inception_d(x, p):
    b3, b7 = conv_heads_1x1(x, p["head"])
    b3 = conv_bn_relu(b3, p["b3_2"], stride=(2, 2))
    b7 = conv_bn_relu(b7, p["b7_2"], padding=(0, 3))
    b7 = conv_bn_relu(b7, p["b7_3"], padding=(3, 0))
    b7 = conv_bn_relu(b7, p["b7_4"], stride=(2, 2))
    bp = pool3x3(x, op="max", stride=2, padding=0)
    return jnp.concatenate([b3, b7, bp], axis=-1)


def inception_e(x, p):
    b1, b3, bd = conv_heads_1x1(x, p["head"])
    b3 = jnp.concatenate(
        [conv_bn_relu(b3, p["b3_2a"], padding=(0, 1)),
         conv_bn_relu(b3, p["b3_2b"], padding=(1, 0))], axis=-1)
    bd = conv_bn_relu(bd, p["b3d_2"], padding=(1, 1))
    bd = jnp.concatenate(
        [conv_bn_relu(bd, p["b3d_3a"], padding=(0, 1)),
         conv_bn_relu(bd, p["b3d_3b"], padding=(1, 0))], axis=-1)
    bp = pool3x3(x, op="avg", stride=1, padding=1)
    bp = conv_bn_relu(bp, p["bp"])
    return jnp.concatenate([b1, b3, bd, bp], axis=-1)


# ----------------------------------------------------------------------------
# Full forward pass (equivalent of Inception.forward)
# ----------------------------------------------------------------------------
def inception_forward(x_nchw, P):
    # layout: accept NCHW (PyTorch), transpose to NHWC; activations in bf16.
    x = jnp.transpose(x_nchw.astype(jnp.float32), (0, 2, 3, 1))
    x = x.astype(jnp.bfloat16)
    x = conv_bn_relu(x, P["c1a"], stride=(2, 2))
    x = conv_bn_relu(x, P["c2a"])
    x = conv_bn_relu(x, P["c2b"], padding=(1, 1))
    x = pool3x3(x, op="max", stride=2, padding=0)
    x = conv_bn_relu(x, P["c3b"])
    x = conv_bn_relu(x, P["c4a"])
    x = pool3x3(x, op="max", stride=2, padding=0)
    x = inception_a(x, P["m5b"])
    x = inception_a(x, P["m5c"])
    x = inception_a(x, P["m5d"])
    x = inception_b(x, P["m6a"])
    x = inception_c(x, P["m6b"])
    x = inception_c(x, P["m6c"])
    x = inception_c(x, P["m6d"])
    x = inception_c(x, P["m6e"])
    x = inception_d(x, P["m7a"])
    x = inception_e(x, P["m7b"])
    x = inception_e(x, P["m7c"])
    # AdaptiveAvgPool -> Dropout(identity, inference) -> Linear(2048,1) -> Sigmoid
    out = gap_fc_sigmoid(x, P["fc_wt"], P["fc_b"])          # (N, 1), f32
    return out


if __name__ == "__main__":
    pg = ParamGen(seed=0)
    params = make_inception_v3(pg)

    # Smallest valid Inception-V3 input is 75x75; batch=2, 3 channels.
    x = jax.random.normal(jax.random.PRNGKey(0), (2, 3, 75, 75), jnp.float32)

    out = inception_forward(x, params)
    out = jax.block_until_ready(out)

    assert out.shape == (2, 1), out.shape
    assert bool(jnp.all(jnp.isfinite(out)))
    assert bool(jnp.all((out > 0.0) & (out < 1.0)))  # sigmoid range
    print("KERNEL_OK")
</pallas_src>

<mosaic_0001>
module attributes {stable_mosaic.version = 11 : i64} {
  func.func @_mm_bias_act_kernel(%arg0: i32, %arg1: i32, %arg2: i32, %arg3: memref<512x128xbf16, #tpu.memory_space<vmem>>, %arg4: memref<128x128xbf16, #tpu.memory_space<vmem>>, %arg5: memref<1x128xf32, #tpu.memory_space<vmem>>, %arg6: memref<512x128xbf16, #tpu.memory_space<vmem>>, %arg7: memref<512x128xf32, #tpu.memory_space<vmem>>) attributes {dimension_semantics = [#tpu.dimension_semantics<parallel>, #tpu.dimension_semantics<parallel>, #tpu.dimension_semantics<arbitrary>], iteration_bounds = array<i64: 6, 1, 1>, scalar_prefetch = 0 : i64, scratch_operands = 1 : i64, tpu.core_type = #tpu.core_type<tc>, window_params = [{transform_indices = @transform_0, window_bounds = array<i64: 512, 128>}, {transform_indices = @transform_1, window_bounds = array<i64: 128, 128>}, {transform_indices = @transform_2, window_bounds = array<i64: 1, 128>}, {transform_indices = @transform_3, window_bounds = array<i64: 512, 128>}]} {
    %c0_i32 = arith.constant 0 : i32
    %0 = arith.cmpi eq, %arg2, %c0_i32 : i32
    %1 = arith.extui %0 : i1 to i32
    %c0_i32_0 = arith.constant 0 : i32
    %2 = arith.cmpi ne, %1, %c0_i32_0 : i32
    scf.if %2 {
      %cst_10 = arith.constant 0.000000e+00 : f32
      %12 = vector.broadcast %cst_10 : f32 to vector<512x128xf32>
      %c0_11 = arith.constant 0 : index
      %c0_12 = arith.constant 0 : index
      %13 = vector.load %arg7[%c0_11, %c0_12] : memref<512x128xf32, #tpu.memory_space<vmem>>, vector<512x128xf32>
      tpu.vector_store %arg7[%c0_11, %c0_12], %12 {strides = array<i32>} : memref<512x128xf32, #tpu.memory_space<vmem>>, vector<512x128xf32>,
    } else {
    }
    %c0 = arith.constant 0 : index
    %c0_1 = arith.constant 0 : index
    %3 = vector.load %arg7[%c0, %c0_1] : memref<512x128xf32, #tpu.memory_space<vmem>>, vector<512x128xf32>
    %c0_2 = arith.constant 0 : index
    %c0_3 = arith.constant 0 : index
    %4 = vector.load %arg3[%c0_2, %c0_3] : memref<512x128xbf16, #tpu.memory_space<vmem>>, vector<512x128xbf16>
    %c0_4 = arith.constant 0 : index
    %c0_5 = arith.constant 0 : index
    %5 = vector.load %arg4[%c0_4, %c0_5] : memref<128x128xbf16, #tpu.memory_space<vmem>>, vector<128x128xbf16>
    %cst = arith.constant dense<0.000000e+00> : vector<512x128xf32>
    %6 = tpu.matmul %4, %5, %cst {dimension_numbers = #tpu.dot_dimension_numbers<[1], [0], [0], [1], [0, 0, 1, 1], [], []>} : vector<512x128xbf16>, vector<128x128xbf16>, vector<512x128xf32> -> vector<512x128xf32>
    %7 = arith.addf %3, %6 : vector<512x128xf32>
    %c0_6 = arith.constant 0 : index
    %c0_7 = arith.constant 0 : index
    %8 = vector.load %arg7[%c0_6, %c0_7] : memref<512x128xf32, #tpu.memory_space<vmem>>, vector<512x128xf32>
    tpu.vector_store %arg7[%c0_6, %c0_7], %7 {strides = array<i32>} : memref<512x128xf32, #tpu.memory_space<vmem>>, vector<512x128xf32>,
    %c0_i32_8 = arith.constant 0 : i32
    %9 = arith.cmpi eq, %arg2, %c0_i32_8 : i32
    %10 = arith.extui %9 : i1 to i32
    %c0_i32_9 = arith.constant 0 : i32
    %11 = arith.cmpi ne, %10, %c0_i32_9 : i32
    scf.if %11 {
      %c0_10 = arith.constant 0 : index
      %c0_11 = arith.constant 0 : index
      %12 = vector.load %arg7[%c0_10, %c0_11] : memref<512x128xf32, #tpu.memory_space<vmem>>, vector<512x128xf32>
      %c0_12 = arith.constant 0 : index
      %c0_13 = arith.constant 0 : index
      %13 = vector.load %arg5[%c0_12, %c0_13] : memref<1x128xf32, #tpu.memory_space<vmem>>, vector<1x128xf32>
      %14 = vector.broadcast %13 : vector<1x128xf32> to vector<512x128xf32>
      %15 = arith.addf %12, %14 : vector<512x128xf32>
      %cst_14 = arith.constant 0.000000e+00 : f32
      %16 = vector.broadcast %cst_14 : f32 to vector<512x128xf32>
      %17 = arith.maximumf %15, %16 : vector<512x128xf32>
      %18 = arith.truncf %17 : vector<512x128xf32> to vector<512x128xbf16>
      %c0_15 = arith.constant 0 : index
      %c0_16 = arith.constant 0 : index
      %19 = vector.load %arg6[%c0_15, %c0_16] : memref<512x128xbf16, #tpu.memory_space<vmem>>, vector<512x128xbf16>
      tpu.vector_store %arg6[%c0_15, %c0_16], %18 {strides = array<i32>} : memref<512x128xbf16, #tpu.memory_space<vmem>>, vector<512x128xbf16>,
    } else {
    }
    return
  }
  func.func @transform_0(%arg0: i32, %arg1: i32, %arg2: i32) -> (i32, i32) {
    %c0_i32 = arith.constant 0 : i32
    return %arg0, %arg2 : i32, i32
  }
  func.func @transform_1(%arg0: i32, %arg1: i32, %arg2: i32) -> (i32, i32) {
    %c0_i32 = arith.constant 0 : i32
    return %arg2, %arg1 : i32, i32
  }
  func.func @transform_2(%arg0: i32, %arg1: i32, %arg2: i32) -> (i32, i32) {
    %c0_i32 = arith.constant 0 : i32
    %c0_i32_0 = arith.constant 0 : i32
    return %c0_i32, %arg1 : i32, i32
  }
  func.func @transform_3(%arg0: i32, %arg1: i32, %arg2: i32) -> (i32, i32) {
    %c0_i32 = arith.constant 0 : i32
    return %arg0, %arg1 : i32, i32
  }
}

</mosaic_0001>

<bundles_post_ra>
// kernel: matmul_bias_act.1
= control target key start
LH: loop header
LB: loop body
LE: loop exit
PB: predicated region body
PF: predicated region fallthrough
CT: control target
= control target key end

     0   :  { %8 = vsyncpa [#allocation4], 0  ;;  %s2957_s0 = inlined_call_operand.hbm [shape: bf16[2738,128], index: 0, kind: input, shape index: {}]   ;;  %s2958_s1 = inlined_call_operand.hbm [shape: bf16[128,128], index: 1, kind: input, shape index: {}]   ;;  %s2959_s2 = inlined_call_operand.vmem [shape: f32[1,128], index: 2, kind: input, shape index: {}]   ;;  %s2960_s3 = inlined_call_operand.vmem [shape: bf16[2738,32], index: 3, kind: output, shape index: {}]  }
   0x1   :  { %10 = vsyncpa [#allocation4 + $0x1], 0 }
   0x2   :  { %11 = vsyncpa [#allocation6], 0  ;;  %s2537_s12 = smov 0   ;;  %s2539_s13 = smov 0  }
   0x3   :  { %s2541_s14 = smov 0   ;;  %s2543_s15 = smov 0  }
   0x4   :  { %s2545_s16 = smov 0   ;;  %s2547_s17 = smov 0  }
   0x5 LB: > { %s1740_s18 = sadd.s32 4294967295, %s2477_s17   ;;  %s36_s19 = sadd.s32 1, %s2473_s16  ;;  %s2477_s17 = sphi %s2547_s17, %s17_s17   ;;  %s2473_s16 = sphi %s2545_s16, %s2976_s16   ;;  %s2469_s15 = sphi %s2543_s15, %s2975_s15   ;;  %s2465_s14 = sphi %s2541_s14, %s2974_s14   ;;  %s2461_s13 = sphi %s2539_s13, %s2973_s13   ;;  %s2457_s12 = sphi %s2537_s12, %s2972_s12  }
   0x6   : > { %p38_p0 = scmp.ge.s32.totalorder %s36_s19, 6  ;;  %s45_s20 = sadd.s32 1, %s2465_s14 }
   0x7   : > { %p52_p1 = scmp.ne.s32.totalorder %s2465_s14, %s2461_s13  ;;  %p53_p2 = scmp.eq.s32.totalorder %s2477_s17, 0 }
   0x8   : > { %s2978_s19 = smov (%p38_p0, %s36_s19), 0  ;;  %p58_p4 = scmp.ne.s32.totalorder %s2461_s13, %s2457_s12 }
   0x9   : > { %p2573_p3 = por %p53_p2, %p52_p1  ;;  %s40_s22 = ssub.s32 %s2473_s16, %s2978_s19 }
   0xa   : > { %p2580_p5 = scmp.eq.s32.totalorder %s1740_s18, 0  ;;  %p43_p6 = scmp.eq.s32.totalorder %s40_s22, 0 }
   0xb   : > { %p138_p7 = scmp.eq.s32.totalorder %s1740_s18, 5  ;;  %p1742_p9 = scmp.ge.s32.totalorder %s2477_s17, 1 }
   0xc   : > { %p2586_p8 = por %p2580_p5, %p58_p4  ;;  %p151_p11 = scmp.lt.s32.totalorder %s2477_s17, 7 }
   0xd   : > { %s2592_s25 = scalar_select %p43_p6, %s2465_s14, %s45_s20  }
   0xe   : > { %p2594_p10 = por %p138_p7, %p52_p1  ;;  %s166_s29 = sshll.u32 %s2958_s1, 4  ;;  %s167_s29 = int_to_ptr.hbm [resolvable:$true] %s166_s29 }
   0xf   : > { %p2602_p12 = pnand %p1742_p9, %p151_p11  ;;  %s2511_s4 = smov [#allocation5]  }
  0x10   : > { %s168_s5 = sshll.u32 %s2511_s4, 4  ;;  %s2512_s6 = smov 64   ;;  %s169_s5 = int_to_ptr.vmem [resolvable:$true] %s168_s5 }
  0x11   : > { %p2198_p13 = pneg %p2602_p12  ;;  %s2513_s7 = smov 4  }
  0x12   : > { %p1745_p1 = scmp.ge.s32.totalorder %s2477_s17, 6 }
  0x13   : > { %p2199_p0 = pnand %p2198_p13, %p2580_p5 }
  0x14   : > { %184 = sbr.rel (%p1745_p1) target bundleno = 61 (0x3d), region = 24 }
  0x15   : > { %2201 = dma.hbm_to_vmem [thread:$0]  (!%p2199_p0), %s167_s29, 1024, %s169_s5, [#allocation6], %s2512_s6, %s2512_s6, %s2513_s7  }
  0x19   : > { %187 = sbr.rel (!%p2573_p3) target bundleno = 61 (0x3d), region = 28  ;;  %s188_s8 = sand.u32 (%p2573_p3), 1, %s2465_s14  }
  0x1a   : > { %s1747_s9 = sshll.u32 (%p2573_p3), %s2473_s16, 6  ;;  %s1746_s10 = sshll.u32 (%p2573_p3), %s188_s8, 8 }
  0x1b   : > { %s194_s11 = ssub.s32 (%p2573_p3), 343, %s1747_s9  ;;  %s2618_s22 = scalar_lea.sflag (%p2573_p3), [#allocation4], %s188_s8 }
  0x1c   : > { %p195_p2 = scmp.lt.s32.totalorder (%p2573_p3), %s194_s11, 64  ;;  %s192_s27 = scalar_lea.vmem (%p2573_p3), [#allocation3], %s1746_s10 }
  0x1e   : > { %s2980_s11 = smov (!%p195_p2, %s194_s11), 64 }
  0x1f   : > { %s1748_s12 = sshll.u32 %s2980_s11, 2 }
  0x20   : > { %s198_s18 = ssub.s32 256, %s1748_s12 }
  0x21   : > { %s199_s20 = sshll.u32 %s198_s18, 4 }
  0x22   : > { %200 = vsyncadd %s2618_s22, %s199_s20  ;;  %p2621_p3 = scmp.ne.s32.totalorder %s1748_s12, 0  ;;  %s1934_s28 = sshll.u32 %s2473_s16, 8 }
  0x23   : > { %s204_s5 = scalar_lea.hbm %s2957_s0, %s1934_s28  ;;  %s2629_s6 = sshll.u32 %s192_s27, 4  ;;  %s209_s6 = int_to_ptr.vmem [resolvable:$true] %s2629_s6 }
  0x24   : > { %s206_s7 = sshll.u32 %s204_s5, 4  ;;  %s1752_s8 = sshll.u32 %s2980_s11, 6  ;;  %s2632_s7 = int_to_ptr.hbm [resolvable:$true] %s206_s7 }
  0x25   : > { %s2352_s9 = sshra.s32 %s2632_s7, 4  ;;  %s2354_s10 = sshrl.u32 %s1752_s8, 4  ;;  %s2353_s9 = int_to_ptr.hbm [resolvable:$true] %s2352_s9 }
  0x26   : > { %s2359_s12 = scalar_lea.hbm %s2353_s9, %s2354_s10  ;;  %s2363_s27 = scalar_lea.hbm %s2957_s0, 1372 }
  0x27   : > { %p2360_p4 = scmp.ne.s32.totalorder %s2353_s9, %s2359_s12  ;;  %p2365_p9 = scmp.lt.s32.totalorder %s2363_s27, %s2359_s12 }
  0x29   : > { %p2361_p6 = pnand %p2360_p4, %p2621_p3 }
  0x2b   : > { %p2362_p7 = pneg %p2361_p6 }
  0x2d   : > { %p2367_p11 = pnand %p2365_p9, %p2362_p7 }
  0x2f   : > { %2370 = shalt.err (!%p2367_p11)
}
  0x30   : > { %s2371_s28 = sshra.s32 %s209_s6, 4  ;;  %s2514_s4 = smov [#allocation3]   ;;  %s2372_s28 = int_to_ptr.vmem [resolvable:$true] %s2371_s28 }
  0x31   : > { %s2378_s29 = scalar_lea.vmem %s2372_s28, %s2354_s10  ;;  %s2382_s5 = scalar_lea.vmem %s2514_s4, 512 }
  0x32   : > { %p2379_p13 = scmp.ne.s32.totalorder %s2372_s28, %s2378_s29  ;;  %p2384_p2 = scmp.lt.s32.totalorder %s2382_s5, %s2378_s29 }
  0x34   : > { %p2380_p0 = pnand %p2379_p13, %p2621_p3 }
  0x36   : > { %p2381_p1 = pneg %p2380_p0 }
  0x38   : > { %p2386_p4 = pnand %p2384_p2, %p2381_p1 }
  0x3a   : > { %2389 = shalt.err (!%p2386_p4)
}
  0x3b   : > { %s2515_s9 = smov 64   ;;  %s2516_s12 = smov 4  }
  0x3c   : > { %214 = dma.hbm_to_vmem [thread:$0]  (%p2621_p3), %s2632_s7, %s1752_s8, %s209_s6, %s2618_s22, %s2515_s9, %s2515_s9, %s2516_s12  }
  0x3d PF: > { %220 = sbr.rel (%p2602_p12) target bundleno = 426 (0x1aa), region = 32  ;;  %s222_s10 = sand.u32 (!%p2602_p12), 1, %s2461_s13  }
  0x3e   : > { %s2658_s18 = sshll.u32 (!%p2602_p12), %s222_s10, 8  ;;  %s223_s20 = scalar_lea.sflag (!%p2602_p12), [#allocation4], %s222_s10 }
  0x3f   : > { %s2661_s27 = scalar_lea.vmem (!%p2602_p12), [#allocation3], %s2658_s18 }
  0x42   : > { %2448 = dma.done.wait (%p2586_p8), %s223_s20, 4096  }
  0x43   : > { %2450 = vsyncadd (%p2586_p8), %s223_s20, 4294963200 }
  0x44   : > { %2452 = dma.done.wait (%p2580_p5), [#allocation6], 1024  }
  0x45   : > { %2454 = vsyncadd (%p2580_p5), [#allocation6], 4294966272  ;;  %v1974_v0 = vld [vmem:[#allocation5 + $0x38] sm:$0xff]  ;;  %v1973_v1 = vld [vmem:[#allocation5 + $0x30] sm:$0xff]  ;;  %s2715_s30 = scalar_lea.vmem [#allocation7], %s2658_s18   ;;  %s1918_s11 = sshll.u32 (%p2594_p10), %s2469_s15, 6 }
  0x46   : > { %723 = vmatpush.bf16.msra.mxu0 %v1974_v0  ;;  %2169 = vmatpush.bf16.msra.mxu1 %v1974_v0  ;;  %v1972_v2 = vld [vmem:[#allocation5 + $0x28] sm:$0xff]  ;;  %v1971_v3 = vld [vmem:[#allocation5 + $0x20] sm:$0xff]  ;;  %v1970_v4 = vld [vmem:[#allocation5 + $0x18] sm:$0xff]  ;;  %s1975_s22 = sshll.u32 (%p2594_p10), %s2469_s15, 8  ;;  %s1355_s21 = ssub.s32 (%p2594_p10), 343, %s1918_s11 }
  0x47   : > { %2170 = vmatpush.bf16.msra.mxu2 %v1974_v0  ;;  %2171 = vmatpush.bf16.msra.mxu3 %v1974_v0  ;;  %v1969_v5 = vld [vmem:[#allocation5 + $0x10] sm:$0xff]  ;;  %v1968_v6 = vld [vmem:[#allocation5 + $0x8] sm:$0xff]  ;;  %v1967_v7 = vld [vmem:[#allocation5] sm:$0xff]  ;;  %s2814_s8 = scalar_lea.vmem (%p2594_p10), %s2960_s3, %s1975_s22   ;;  %p1356_p5 = scmp.lt.s32.totalorder (%p2594_p10), %s1355_s21, 64 }
  0x48   : > { %v1935_v8 = vld [vmem:[%s2661_s27] sm:$0xff]  ;;  %v1936_v12 = vld [vmem:[%s2661_s27 + $0x8] sm:$0xff]  ;;  %v1937_v16 = vld [vmem:[%s2661_s27 + $0x10] sm:$0xff] }
  0x49   : > { %v1943_v9 = vld [vmem:[%s2661_s27 + $0x40] sm:$0xff]  ;;  %v1944_v13 = vld [vmem:[%s2661_s27 + $0x48] sm:$0xff]  ;;  %v1945_v17 = vld [vmem:[%s2661_s27 + $0x50] sm:$0xff] }
  0x4a   : > { %724 = vmatpush.bf16.msra.mxu0 %v1973_v1  ;;  %2172 = vmatpush.bf16.msra.mxu1 %v1973_v1  ;;  %v1951_v10 = vld [vmem:[%s2661_s27 + $0x80] sm:$0xff]  ;;  %v1952_v14 = vld [vmem:[%s2661_s27 + $0x88] sm:$0xff]  ;;  %v1953_v18 = vld [vmem:[%s2661_s27 + $0x90] sm:$0xff] }
  0x4b   : > { %2173 = vmatpush.bf16.msra.mxu2 %v1973_v1  ;;  %2174 = vmatpush.bf16.msra.mxu3 %v1973_v1  ;;  %v1959_v11 = vld [vmem:[%s2661_s27 + $0xc0] sm:$0xff]  ;;  %v1960_v15 = vld [vmem:[%s2661_s27 + $0xc8] sm:$0xff]  ;;  %v1961_v19 = vld [vmem:[%s2661_s27 + $0xd0] sm:$0xff] }
  0x4c   : > { %v1938_v20 = vld [vmem:[%s2661_s27 + $0x18] sm:$0xff]  ;;  %v1939_v24 = vld [vmem:[%s2661_s27 + $0x20] sm:$0xff]  ;;  %v1940_v28 = vld [vmem:[%s2661_s27 + $0x28] sm:$0xff] }
  0x4d   : > { %v1946_v21 = vld [vmem:[%s2661_s27 + $0x58] sm:$0xff]  ;;  %v1947_v25 = vld [vmem:[%s2661_s27 + $0x60] sm:$0xff]  ;;  %v1948_v29 = vld [vmem:[%s2661_s27 + $0x68] sm:$0xff] }
  0x4e   : > { %725 = vmatpush.bf16.msra.mxu0 %v1972_v2  ;;  %2175 = vmatpush.bf16.msra.mxu1 %v1972_v2  ;;  %v1954_v22 = vld [vmem:[%s2661_s27 + $0x98] sm:$0xff]  ;;  %v1955_v26 = vld [vmem:[%s2661_s27 + $0xa0] sm:$0xff]  ;;  %v1956_v30 = vld [vmem:[%s2661_s27 + $0xa8] sm:$0xff] }
  0x4f   : > { %2176 = vmatpush.bf16.msra.mxu2 %v1972_v2  ;;  %2177 = vmatpush.bf16.msra.mxu3 %v1972_v2  ;;  %v1962_v23 = vld [vmem:[%s2661_s27 + $0xd8] sm:$0xff]  ;;  %v1963_v27 = vld [vmem:[%s2661_s27 + $0xe0] sm:$0xff]  ;;  %v1964_v31 = vld [vmem:[%s2661_s27 + $0xe8] sm:$0xff] }
  0x50   : > { %v1941_v32 = vld [vmem:[%s2661_s27 + $0x30] sm:$0xff]  ;;  %v1942_v36 = vld [vmem:[%s2661_s27 + $0x38] sm:$0xff]  ;;  %v2706_v42 = vld [vmem:[%s2959_s2] ss:$0 sm:$0xff] }
  0x51   : > { %v1949_v33 = vld [vmem:[%s2661_s27 + $0x70] sm:$0xff]  ;;  %v1950_v37 = vld [vmem:[%s2661_s27 + $0x78] sm:$0xff] }
  0x52   : > { %726 = vmatpush.bf16.msra.mxu0 %v1971_v3  ;;  %2178 = vmatpush.bf16.msra.mxu1 %v1971_v3  ;;  %v1957_v34 = vld [vmem:[%s2661_s27 + $0xb0] sm:$0xff]  ;;  %v1958_v38 = vld [vmem:[%s2661_s27 + $0xb8] sm:$0xff] }
  0x53   : > { %2179 = vmatpush.bf16.msra.mxu2 %v1971_v3  ;;  %2180 = vmatpush.bf16.msra.mxu3 %v1971_v3  ;;  %v1965_v35 = vld [vmem:[%s2661_s27 + $0xf0] sm:$0xff]  ;;  %v1966_v39 = vld [vmem:[%s2661_s27 + $0xf8] sm:$0xff] }
  0x56   : > { %727 = vmatpush.bf16.msra.mxu0 %v1970_v4  ;;  %2181 = vmatpush.bf16.msra.mxu1 %v1970_v4 }
  0x57   : > { %2182 = vmatpush.bf16.msra.mxu2 %v1970_v4  ;;  %2183 = vmatpush.bf16.msra.mxu3 %v1970_v4 }
  0x5a   : > { %728 = vmatpush.bf16.msra.mxu0 %v1969_v5  ;;  %2184 = vmatpush.bf16.msra.mxu1 %v1969_v5 }
  0x5b   : > { %2185 = vmatpush.bf16.msra.mxu2 %v1969_v5  ;;  %2186 = vmatpush.bf16.msra.mxu3 %v1969_v5 }
  0x5e   : > { %729 = vmatpush.bf16.msra.mxu0 %v1968_v6  ;;  %2187 = vmatpush.bf16.msra.mxu1 %v1968_v6 }
  0x5f   : > { %2188 = vmatpush.bf16.msra.mxu2 %v1968_v6  ;;  %2189 = vmatpush.bf16.msra.mxu3 %v1968_v6 }
  0x62   : > { %730 = vmatpush.bf16.msra.mxu0 %v1967_v7  ;;  %2190 = vmatpush.bf16.msra.mxu1 %v1967_v7 }
  0x63   : > { %2191 = vmatpush.bf16.msra.mxu2 %v1967_v7  ;;  %2192 = vmatpush.bf16.msra.mxu3 %v1967_v7 }
  0x65   : > { %731 = vmatmul.bf16.vlgmr.msra.gmra.mxu0 %v1935_v8  ;;  %771 = vmatmul.bf16.vlgmr.msra.gmra.mxu1 %v1943_v9 }
  0x66   : > { %811 = vmatmul.bf16.vlgmr.msra.gmra.mxu2 %v1951_v10  ;;  %851 = vmatmul.bf16.vlgmr.msra.gmra.mxu3 %v1959_v11 }
  0x75   : > { %736 = vmatmul.bf16.gmra.mxu0 %v1936_v12  ;;  %776 = vmatmul.bf16.gmra.mxu1 %v1944_v13 }
  0x76   : > { %816 = vmatmul.bf16.gmra.mxu2 %v1952_v14  ;;  %856 = vmatmul.bf16.gmra.mxu3 %v1960_v15 }
  0x85   : > { %741 = vmatmul.bf16.gmra.mxu0 %v1937_v16  ;;  %781 = vmatmul.bf16.gmra.mxu1 %v1945_v17 }
  0x86   : > { %821 = vmatmul.bf16.gmra.mxu2 %v1953_v18  ;;  %861 = vmatmul.bf16.gmra.mxu3 %v1961_v19 }
  0x95   : > { %746 = vmatmul.bf16.gmra.mxu0 %v1938_v20  ;;  %786 = vmatmul.bf16.gmra.mxu1 %v1946_v21 }
  0x96   : > { %826 = vmatmul.bf16.gmra.mxu2 %v1954_v22  ;;  %866 = vmatmul.bf16.gmra.mxu3 %v1962_v23 }
  0xa5   : > { %751 = vmatmul.bf16.gmra.mxu0 %v1939_v24  ;;  %791 = vmatmul.bf16.gmra.mxu1 %v1947_v25 }
  0xa6   : > { %831 = vmatmul.bf16.gmra.mxu2 %v1955_v26  ;;  %871 = vmatmul.bf16.gmra.mxu3 %v1963_v27 }
  0xb5   : > { %756 = vmatmul.bf16.gmra.mxu0 %v1940_v28  ;;  %796 = vmatmul.bf16.gmra.mxu1 %v1948_v29 }
  0xb6   : > { %836 = vmatmul.bf16.gmra.mxu2 %v1956_v30  ;;  %876 = vmatmul.bf16.gmra.mxu3 %v1964_v31 }
  0xc5   : > { %761 = vmatmul.bf16.gmra.mxu0 %v1941_v32  ;;  %801 = vmatmul.bf16.gmra.mxu1 %v1949_v33 }
  0xc6   : > { %841 = vmatmul.bf16.gmra.mxu2 %v1957_v34  ;;  %881 = vmatmul.bf16.gmra.mxu3 %v1965_v35 }
  0xd5   : > { %766 = vmatmul.bf16.gmra.mxu0 %v1942_v36  ;;  %806 = vmatmul.bf16.gmra.mxu1 %v1950_v37 }
  0xd6   : > { %846 = vmatmul.bf16.gmra.mxu2 %v1958_v38  ;;  %886 = vmatmul.bf16.gmra.mxu3 %v1966_v39 }
  0xe2   : > { %v732_v40 = vpop.f32.mrf.mxu0  ;;  %v772_v41 = vpop.f32.mrf.mxu1 }
  0xe3   : > { %v1091_v43 = vadd.f32 %v2706_v42, %v732_v40  ;;  %v1107_v44 = vadd.f32 %v2706_v42, %v772_v41 }
  0xe5   : > { %v1155_v51 = vmax.f32 %v1091_v43, 0.0  ;;  %v1171_v52 = vmax.f32 %v1107_v44, 0.0 }
  0xe9   : > { %v812_v45 = vpop.f32.mrf.mxu2  ;;  %v852_v46 = vpop.f32.mrf.mxu3 }
  0xea   : > { %v734_v47 = vpop.f32.mrf.mxu0  ;;  %v774_v48 = vpop.f32.mrf.mxu1  ;;  %v1123_v57 = vadd.f32 %v2706_v42, %v812_v45  ;;  %v1139_v58 = vadd.f32 %v2706_v42, %v852_v46 }
  0xeb   : > { %v1092_v49 = vadd.f32 %v2706_v42, %v734_v47  ;;  %v1108_v50 = vadd.f32 %v2706_v42, %v774_v48 }
  0xec   : > { %v1187_v1 = vmax.f32 %v1123_v57, 0.0  ;;  %v1203_v2 = vmax.f32 %v1139_v58, 0.0 }
  0xed   : > { %v1156_v53 = vmax.f32 %v1092_v49, 0.0  ;;  %v1172_v54 = vmax.f32 %v1108_v50, 0.0 }
  0xef   : > { %v1981_v55 = vpack.c.bf16 %v1156_v53, %v1155_v51  ;;  %v2021_v56 = vpack.c.bf16 %v1172_v54, %v1171_v52 }
  0xf1   : > { %1982 = vst [vmem:[%s2715_s30] sm:$0xff] %v1981_v55   ;;  %v814_v59 = vpop.f32.mrf.mxu2  ;;  %v854_v60 = vpop.f32.mrf.mxu3 }
  0xf2   : > { %2145 = vst [vmem:[%s2715_s30 + $0x40] sm:$0xff] %v2021_v56   ;;  %v1124_v61 = vadd.f32 %v2706_v42, %v814_v59  ;;  %v1140_v62 = vadd.f32 %v2706_v42, %v854_v60  ;;  %v737_v63 = vpop.f32.mrf.mxu0  ;;  %v777_v0 = vpop.f32.mrf.mxu1 }
  0xf3   : > { %v1093_v7 = vadd.f32 %v2706_v42, %v737_v63  ;;  %v1109_v8 = vadd.f32 %v2706_v42, %v777_v0 }
  0xf4   : > { %v1188_v3 = vmax.f32 %v1124_v61, 0.0  ;;  %v1204_v4 = vmax.f32 %v1140_v62, 0.0 }
  0xf5   : > { %v1157_v15 = vmax.f32 %v1093_v7, 0.0  ;;  %v1173_v16 = vmax.f32 %v1109_v8, 0.0 }
  0xf6   : > { %v2061_v5 = vpack.c.bf16 %v1188_v3, %v1187_v1  ;;  %v2101_v6 = vpack.c.bf16 %v1204_v4, %v1203_v2 }
  0xf8   : > { %2153 = vst [vmem:[%s2715_s30 + $0x80] sm:$0xff] %v2061_v5  }
  0xf9   : > { %2161 = vst [vmem:[%s2715_s30 + $0xc0] sm:$0xff] %v2101_v6   ;;  %v817_v9 = vpop.f32.mrf.mxu2  ;;  %v857_v10 = vpop.f32.mrf.mxu3 }
  0xfa   : > { %v739_v11 = vpop.f32.mrf.mxu0  ;;  %v779_v12 = vpop.f32.mrf.mxu1  ;;  %v1125_v21 = vadd.f32 %v2706_v42, %v817_v9  ;;  %v1141_v22 = vadd.f32 %v2706_v42, %v857_v10 }
  0xfb   : > { %v1094_v13 = vadd.f32 %v2706_v42, %v739_v11  ;;  %v1110_v14 = vadd.f32 %v2706_v42, %v779_v12 }
  0xfc   : > { %v1189_v29 = vmax.f32 %v1125_v21, 0.0  ;;  %v1205_v30 = vmax.f32 %v1141_v22, 0.0 }
  0xfd   : > { %v1158_v17 = vmax.f32 %v1094_v13, 0.0  ;;  %v1174_v18 = vmax.f32 %v1110_v14, 0.0 }
  0xff   : > { %v1986_v19 = vpack.c.bf16 %v1158_v17, %v1157_v15  ;;  %v2026_v20 = vpack.c.bf16 %v1174_v18, %v1173_v16 }
 0x101   : > { %2138 = vst [vmem:[%s2715_s30 + $0x8] sm:$0xff] %v1986_v19   ;;  %v819_v23 = vpop.f32.mrf.mxu2  ;;  %v859_v24 = vpop.f32.mrf.mxu3 }
 0x102   : > { %2146 = vst [vmem:[%s2715_s30 + $0x48] sm:$0xff] %v2026_v20   ;;  %v1126_v25 = vadd.f32 %v2706_v42, %v819_v23  ;;  %v1142_v26 = vadd.f32 %v2706_v42, %v859_v24  ;;  %v742_v27 = vpop.f32.mrf.mxu0  ;;  %v782_v28 = vpop.f32.mrf.mxu1 }
 0x103   : > { %v1095_v35 = vadd.f32 %v2706_v42, %v742_v27  ;;  %v1111_v36 = vadd.f32 %v2706_v42, %v782_v28 }
 0x104   : > { %v1190_v31 = vmax.f32 %v1126_v25, 0.0  ;;  %v1206_v32 = vmax.f32 %v1142_v26, 0.0 }
 0x105   : > { %v1159_v44 = vmax.f32 %v1095_v35, 0.0  ;;  %v1175_v45 = vmax.f32 %v1111_v36, 0.0 }
 0x106   : > { %v2066_v33 = vpack.c.bf16 %v1190_v31, %v1189_v29  ;;  %v2106_v34 = vpack.c.bf16 %v1206_v32, %v1205_v30 }
 0x108   : > { %2154 = vst [vmem:[%s2715_s30 + $0x88] sm:$0xff] %v2066_v33  }
 0x109   : > { %2162 = vst [vmem:[%s2715_s30 + $0xc8] sm:$0xff] %v2106_v34   ;;  %v822_v37 = vpop.f32.mrf.mxu2  ;;  %v862_v38 = vpop.f32.mrf.mxu3 }
 0x10a   : > { %v744_v39 = vpop.f32.mrf.mxu0  ;;  %v784_v40 = vpop.f32.mrf.mxu1  ;;  %v1127_v50 = vadd.f32 %v2706_v42, %v822_v37  ;;  %v1143_v51 = vadd.f32 %v2706_v42, %v862_v38 }
 0x10b   : > { %v1096_v41 = vadd.f32 %v2706_v42, %v744_v39  ;;  %v1112_v43 = vadd.f32 %v2706_v42, %v784_v40 }
 0x10c   : > { %v1191_v58 = vmax.f32 %v1127_v50, 0.0  ;;  %v1207_v59 = vmax.f32 %v1143_v51, 0.0 }
 0x10d   : > { %v1160_v46 = vmax.f32 %v1096_v41, 0.0  ;;  %v1176_v47 = vmax.f32 %v1112_v43, 0.0 }
 0x10f   : > { %v1991_v48 = vpack.c.bf16 %v1160_v46, %v1159_v44  ;;  %v2031_v49 = vpack.c.bf16 %v1176_v47, %v1175_v45 }
 0x111   : > { %2139 = vst [vmem:[%s2715_s30 + $0x10] sm:$0xff] %v1991_v48   ;;  %v824_v52 = vpop.f32.mrf.mxu2  ;;  %v864_v53 = vpop.f32.mrf.mxu3 }
 0x112   : > { %2147 = vst [vmem:[%s2715_s30 + $0x50] sm:$0xff] %v2031_v49   ;;  %v1128_v54 = vadd.f32 %v2706_v42, %v824_v52  ;;  %v1144_v55 = vadd.f32 %v2706_v42, %v864_v53  ;;  %v747_v56 = vpop.f32.mrf.mxu0  ;;  %v787_v57 = vpop.f32.mrf.mxu1 }
 0x113   : > { %v1097_v0 = vadd.f32 %v2706_v42, %v747_v56  ;;  %v1113_v1 = vadd.f32 %v2706_v42, %v787_v57 }
 0x114   : > { %v1192_v60 = vmax.f32 %v1128_v54, 0.0  ;;  %v1208_v61 = vmax.f32 %v1144_v55, 0.0 }
 0x115   : > { %v1161_v8 = vmax.f32 %v1097_v0, 0.0  ;;  %v1177_v9 = vmax.f32 %v1113_v1, 0.0 }
 0x116   : > { %v2071_v62 = vpack.c.bf16 %v1192_v60, %v1191_v58  ;;  %v2111_v63 = vpack.c.bf16 %v1208_v61, %v1207_v59 }
 0x118   : > { %2155 = vst [vmem:[%s2715_s30 + $0x90] sm:$0xff] %v2071_v62  }
 0x119   : > { %2163 = vst [vmem:[%s2715_s30 + $0xd0] sm:$0xff] %v2111_v63   ;;  %v827_v2 = vpop.f32.mrf.mxu2  ;;  %v867_v3 = vpop.f32.mrf.mxu3 }
 0x11a   : > { %v749_v4 = vpop.f32.mrf.mxu0  ;;  %v789_v5 = vpop.f32.mrf.mxu1  ;;  %v1129_v14 = vadd.f32 %v2706_v42, %v827_v2  ;;  %v1145_v15 = vadd.f32 %v2706_v42, %v867_v3 }
 0x11b   : > { %v1098_v6 = vadd.f32 %v2706_v42, %v749_v4  ;;  %v1114_v7 = vadd.f32 %v2706_v42, %v789_v5 }
 0x11c   : > { %v1193_v22 = vmax.f32 %v1129_v14, 0.0  ;;  %v1209_v23 = vmax.f32 %v1145_v15, 0.0 }
 0x11d   : > { %v1162_v10 = vmax.f32 %v1098_v6, 0.0  ;;  %v1178_v11 = vmax.f32 %v1114_v7, 0.0 }
 0x11f   : > { %v1996_v12 = vpack.c.bf16 %v1162_v10, %v1161_v8  ;;  %v2036_v13 = vpack.c.bf16 %v1178_v11, %v1177_v9 }
 0x121   : > { %2140 = vst [vmem:[%s2715_s30 + $0x18] sm:$0xff] %v1996_v12   ;;  %v829_v16 = vpop.f32.mrf.mxu2  ;;  %v869_v17 = vpop.f32.mrf.mxu3 }
 0x122   : > { %2148 = vst [vmem:[%s2715_s30 + $0x58] sm:$0xff] %v2036_v13   ;;  %v1130_v18 = vadd.f32 %v2706_v42, %v829_v16  ;;  %v1146_v19 = vadd.f32 %v2706_v42, %v869_v17  ;;  %v752_v20 = vpop.f32.mrf.mxu0  ;;  %v792_v21 = vpop.f32.mrf.mxu1 }
 0x123   : > { %v1099_v28 = vadd.f32 %v2706_v42, %v752_v20  ;;  %v1115_v29 = vadd.f32 %v2706_v42, %v792_v21 }
 0x124   : > { %v1194_v24 = vmax.f32 %v1130_v18, 0.0  ;;  %v1210_v25 = vmax.f32 %v1146_v19, 0.0 }
 0x125   : > { %v1163_v36 = vmax.f32 %v1099_v28, 0.0  ;;  %v1179_v37 = vmax.f32 %v1115_v29, 0.0 }
 0x126   : > { %v2076_v26 = vpack.c.bf16 %v1194_v24, %v1193_v22  ;;  %v2116_v27 = vpack.c.bf16 %v1210_v25, %v1209_v23 }
 0x128   : > { %2156 = vst [vmem:[%s2715_s30 + $0x98] sm:$0xff] %v2076_v26  }
 0x129   : > { %2164 = vst [vmem:[%s2715_s30 + $0xd8] sm:$0xff] %v2116_v27   ;;  %v832_v30 = vpop.f32.mrf.mxu2  ;;  %v872_v31 = vpop.f32.mrf.mxu3 }
 0x12a   : > { %v754_v32 = vpop.f32.mrf.mxu0  ;;  %v794_v33 = vpop.f32.mrf.mxu1  ;;  %v1131_v43 = vadd.f32 %v2706_v42, %v832_v30  ;;  %v1147_v44 = vadd.f32 %v2706_v42, %v872_v31 }
 0x12b   : > { %v1100_v34 = vadd.f32 %v2706_v42, %v754_v32  ;;  %v1116_v35 = vadd.f32 %v2706_v42, %v794_v33 }
 0x12c   : > { %v1195_v51 = vmax.f32 %v1131_v43, 0.0  ;;  %v1211_v52 = vmax.f32 %v1147_v44, 0.0 }
 0x12d   : > { %v1164_v38 = vmax.f32 %v1100_v34, 0.0  ;;  %v1180_v39 = vmax.f32 %v1116_v35, 0.0 }
 0x12f   : > { %v2001_v40 = vpack.c.bf16 %v1164_v38, %v1163_v36  ;;  %v2041_v41 = vpack.c.bf16 %v1180_v39, %v1179_v37 }
 0x131   : > { %2141 = vst [vmem:[%s2715_s30 + $0x20] sm:$0xff] %v2001_v40   ;;  %v834_v45 = vpop.f32.mrf.mxu2  ;;  %v874_v46 = vpop.f32.mrf.mxu3 }
 0x132   : > { %2149 = vst [vmem:[%s2715_s30 + $0x60] sm:$0xff] %v2041_v41   ;;  %v1132_v47 = vadd.f32 %v2706_v42, %v834_v45  ;;  %v1148_v48 = vadd.f32 %v2706_v42, %v874_v46  ;;  %v757_v49 = vpop.f32.mrf.mxu0  ;;  %v797_v50 = vpop.f32.mrf.mxu1 }
 0x133   : > { %v1101_v57 = vadd.f32 %v2706_v42, %v757_v49  ;;  %v1117_v58 = vadd.f32 %v2706_v42, %v797_v50 }
 0x134   : > { %v1196_v53 = vmax.f32 %v1132_v47, 0.0  ;;  %v1212_v54 = vmax.f32 %v1148_v48, 0.0 }
 0x135   : > { %v1165_v1 = vmax.f32 %v1101_v57, 0.0  ;;  %v1181_v2 = vmax.f32 %v1117_v58, 0.0 }
 0x136   : > { %v2081_v55 = vpack.c.bf16 %v1196_v53, %v1195_v51  ;;  %v2121_v56 = vpack.c.bf16 %v1212_v54, %v1211_v52 }
 0x138   : > { %2157 = vst [vmem:[%s2715_s30 + $0xa0] sm:$0xff] %v2081_v55  }
 0x139   : > { %2165 = vst [vmem:[%s2715_s30 + $0xe0] sm:$0xff] %v2121_v56   ;;  %v837_v59 = vpop.f32.mrf.mxu2  ;;  %v877_v60 = vpop.f32.mrf.mxu3 }
 0x13a   : > { %v759_v61 = vpop.f32.mrf.mxu0  ;;  %v799_v62 = vpop.f32.mrf.mxu1  ;;  %v1133_v7 = vadd.f32 %v2706_v42, %v837_v59  ;;  %v1149_v8 = vadd.f32 %v2706_v42, %v877_v60 }
 0x13b   : > { %v1102_v63 = vadd.f32 %v2706_v42, %v759_v61  ;;  %v1118_v0 = vadd.f32 %v2706_v42, %v799_v62 }
 0x13c   : > { %v1197_v15 = vmax.f32 %v1133_v7, 0.0  ;;  %v1213_v16 = vmax.f32 %v1149_v8, 0.0 }
 0x13d   : > { %v1166_v3 = vmax.f32 %v1102_v63, 0.0  ;;  %v1182_v4 = vmax.f32 %v1118_v0, 0.0 }
 0x13f   : > { %v2006_v5 = vpack.c.bf16 %v1166_v3, %v1165_v1  ;;  %v2046_v6 = vpack.c.bf16 %v1182_v4, %v1181_v2 }
 0x141   : > { %2142 = vst [vmem:[%s2715_s30 + $0x28] sm:$0xff] %v2006_v5   ;;  %v839_v9 = vpop.f32.mrf.mxu2  ;;  %v879_v10 = vpop.f32.mrf.mxu3 }
 0x142   : > { %2150 = vst [vmem:[%s2715_s30 + $0x68] sm:$0xff] %v2046_v6   ;;  %v1134_v11 = vadd.f32 %v2706_v42, %v839_v9  ;;  %v1150_v12 = vadd.f32 %v2706_v42, %v879_v10  ;;  %v762_v13 = vpop.f32.mrf.mxu0  ;;  %v802_v14 = vpop.f32.mrf.mxu1 }
 0x143   : > { %v1103_v21 = vadd.f32 %v2706_v42, %v762_v13  ;;  %v1119_v22 = vadd.f32 %v2706_v42, %v802_v14 }
 0x144   : > { %v1198_v17 = vmax.f32 %v1134_v11, 0.0  ;;  %v1214_v18 = vmax.f32 %v1150_v12, 0.0 }
 0x145   : > { %v1167_v29 = vmax.f32 %v1103_v21, 0.0  ;;  %v1183_v30 = vmax.f32 %v1119_v22, 0.0 }
 0x146   : > { %v2086_v19 = vpack.c.bf16 %v1198_v17, %v1197_v15  ;;  %v2126_v20 = vpack.c.bf16 %v1214_v18, %v1213_v16 }
 0x148   : > { %2158 = vst [vmem:[%s2715_s30 + $0xa8] sm:$0xff] %v2086_v19  }
 0x149   : > { %2166 = vst [vmem:[%s2715_s30 + $0xe8] sm:$0xff] %v2126_v20   ;;  %v842_v23 = vpop.f32.mrf.mxu2  ;;  %v882_v24 = vpop.f32.mrf.mxu3 }
 0x14a   : > { %v764_v25 = vpop.f32.mrf.mxu0  ;;  %v804_v26 = vpop.f32.mrf.mxu1  ;;  %v1135_v35 = vadd.f32 %v2706_v42, %v842_v23  ;;  %v1151_v36 = vadd.f32 %v2706_v42, %v882_v24 }
 0x14b   : > { %v1104_v27 = vadd.f32 %v2706_v42, %v764_v25  ;;  %v1120_v28 = vadd.f32 %v2706_v42, %v804_v26 }
 0x14c   : > { %v1199_v44 = vmax.f32 %v1135_v35, 0.0  ;;  %v1215_v45 = vmax.f32 %v1151_v36, 0.0 }
 0x14d   : > { %v1168_v31 = vmax.f32 %v1104_v27, 0.0  ;;  %v1184_v32 = vmax.f32 %v1120_v28, 0.0 }
 0x14f   : > { %v2011_v33 = vpack.c.bf16 %v1168_v31, %v1167_v29  ;;  %v2051_v34 = vpack.c.bf16 %v1184_v32, %v1183_v30 }
 0x151   : > { %2143 = vst [vmem:[%s2715_s30 + $0x30] sm:$0xff] %v2011_v33   ;;  %v844_v37 = vpop.f32.mrf.mxu2  ;;  %v884_v38 = vpop.f32.mrf.mxu3 }
 0x152   : > { %2151 = vst [vmem:[%s2715_s30 + $0x70] sm:$0xff] %v2051_v34   ;;  %v1136_v39 = vadd.f32 %v2706_v42, %v844_v37  ;;  %v1152_v40 = vadd.f32 %v2706_v42, %v884_v38  ;;  %v767_v41 = vpop.f32.mrf.mxu0  ;;  %v807_v43 = vpop.f32.mrf.mxu1 }
 0x153   : > { %v1105_v50 = vadd.f32 %v2706_v42, %v767_v41  ;;  %v1121_v51 = vadd.f32 %v2706_v42, %v807_v43 }
 0x154   : > { %v1200_v46 = vmax.f32 %v1136_v39, 0.0  ;;  %v1216_v47 = vmax.f32 %v1152_v40, 0.0 }
 0x155   : > { %v1169_v58 = vmax.f32 %v1105_v50, 0.0  ;;  %v1185_v59 = vmax.f32 %v1121_v51, 0.0 }
 0x156   : > { %v2091_v48 = vpack.c.bf16 %v1200_v46, %v1199_v44  ;;  %v2131_v49 = vpack.c.bf16 %v1216_v47, %v1215_v45 }
 0x158   : > { %2159 = vst [vmem:[%s2715_s30 + $0xb0] sm:$0xff] %v2091_v48  }
 0x159   : > { %2167 = vst [vmem:[%s2715_s30 + $0xf0] sm:$0xff] %v2131_v49   ;;  %v847_v52 = vpop.f32.mrf.mxu2  ;;  %v887_v53 = vpop.f32.mrf.mxu3 }
 0x15a   : > { %v769_v54 = vpop.f32.mrf.mxu0  ;;  %v809_v55 = vpop.f32.mrf.mxu1  ;;  %v1137_v0 = vadd.f32 %v2706_v42, %v847_v52  ;;  %v1153_v1 = vadd.f32 %v2706_v42, %v887_v53 }
 0x15b   : > { %v1106_v56 = vadd.f32 %v2706_v42, %v769_v54  ;;  %v1122_v57 = vadd.f32 %v2706_v42, %v809_v55 }
 0x15c   : > { %v1201_v6 = vmax.f32 %v1137_v0, 0.0  ;;  %v1217_v7 = vmax.f32 %v1153_v1, 0.0 }
 0x15d   : > { %v1170_v60 = vmax.f32 %v1106_v56, 0.0  ;;  %v1186_v61 = vmax.f32 %v1122_v57, 0.0 }
 0x15f   : > { %v2016_v62 = vpack.c.bf16 %v1170_v60, %v1169_v58  ;;  %v2056_v63 = vpack.c.bf16 %v1186_v61, %v1185_v59 }
 0x161   : > { %2144 = vst [vmem:[%s2715_s30 + $0x38] sm:$0xff] %v2016_v62   ;;  %v849_v2 = vpop.f32.mrf.mxu2  ;;  %v889_v3 = vpop.f32.mrf.mxu3 }
 0x162   : > { %2152 = vst [vmem:[%s2715_s30 + $0x78] sm:$0xff] %v2056_v63   ;;  %v1138_v4 = vadd.f32 %v2706_v42, %v849_v2  ;;  %v1154_v5 = vadd.f32 %v2706_v42, %v889_v3 }
 0x164   : > { %v1202_v8 = vmax.f32 %v1138_v4, 0.0  ;;  %v1218_v9 = vmax.f32 %v1154_v5, 0.0 }
 0x165   : > { %1353 = sbr.rel (!%p2594_p10) target bundleno = 426 (0x1aa), region = 52 }
 0x166   : > { %v2096_v10 = vpack.c.bf16 %v1202_v8, %v1201_v6  ;;  %v2136_v11 = vpack.c.bf16 %v1218_v9, %v1217_v7 }
 0x168   : > { %2160 = vst [vmem:[%s2715_s30 + $0xb8] sm:$0xff] %v2096_v10  }
 0x169   : > { %2168 = vst [vmem:[%s2715_s30 + $0xf8] sm:$0xff] %v2136_v11  }
 0x16a   : > { %s2982_s21 = smov (!%p1356_p5, %s1355_s21), 64 }
 0x16b   : > { %s1919_s28 = sshll.u32 %s2982_s21, 2 }
 0x16c   : > { %p1922_p8 = scmp.eq.s32.totalorder %s1919_s28, 0 }
 0x16d   : > { %s2820_s26 = sshrl.u32 (!%p1922_p8), %s2982_s21, 5 }
 0x16e   : > { %1365 = sbr.rel (%p1922_p8) target bundleno = 426 (0x1aa), region = 56  ;;  %p1923_p10 = scmp.le.s32.totalorder (!%p1922_p8), %s2820_s26, 0 }
 0x173   : > { %1664 = sbr.rel (%p1923_p10) target bundleno = 409 (0x199), region = 138  ;;  %s2967_s15 = smov (!%p1923_p10), %s2814_s8 }
 0x174   : > { %s2968_s29 = smov (!%p1923_p10), %s2715_s30  ;;  %s2829_s4 = smov (!%p1923_p10), 0  }
 0x175   : > { %s2831_s5 = smov (!%p1923_p10), 0  }
 0x178 LB: >> { %v1382_v42 = vld [vmem:[%s2485_s29] sm:$0xf]  ;;  %v1384_v12 = vld [vmem:[%s2485_s29 + $0x4] sm:$0xf]  ;;  %v1386_v13 = vld [vmem:[%s2485_s29 + $0x8] sm:$0xf]  ;;  %s2493_s5 = sphi %s2831_s5, %s1376_s5   ;;  %s2489_s4 = sphi %s2829_s4, %s2971_s4   ;;  %s2485_s29 = sphi %s2968_s29, %s2970_s29   ;;  %s2481_s15 = sphi %s2967_s15, %s2969_s15  }
 0x179   : >> { %1383 = vst [vmem:[%s2481_s15] sm:$0xf] %v1382_v42  ;;  %v1388_v14 = vld [vmem:[%s2485_s29 + $0xc] sm:$0xf]  ;;  %v1390_v15 = vld [vmem:[%s2485_s29 + $0x10] sm:$0xf]  ;;  %s1446_s9 = sadd.s32 1, %s2489_s4 }
 0x17a   : >> { %1385 = vst [vmem:[%s2481_s15 + $0x4] sm:$0xf] %v1384_v12  ;;  %v1392_v16 = vld [vmem:[%s2485_s29 + $0x14] sm:$0xf]  ;;  %v1394_v17 = vld [vmem:[%s2485_s29 + $0x18] sm:$0xf]  ;;  %p1447_p12 = scmp.ge.s32.totalorder %s1446_s9, %s2820_s26 }
 0x17b   : >> { %1387 = vst [vmem:[%s2481_s15 + $0x8] sm:$0xf] %v1386_v13  ;;  %v1396_v18 = vld [vmem:[%s2485_s29 + $0x1c] sm:$0xf]  ;;  %v1398_v19 = vld [vmem:[%s2485_s29 + $0x20] sm:$0xf] }
 0x17c   : >> { %1389 = vst [vmem:[%s2481_s15 + $0xc] sm:$0xf] %v1388_v14  ;;  %v1400_v20 = vld [vmem:[%s2485_s29 + $0x24] sm:$0xf]  ;;  %v1402_v21 = vld [vmem:[%s2485_s29 + $0x28] sm:$0xf] }
 0x17d   : >> { %1391 = vst [vmem:[%s2481_s15 + $0x10] sm:$0xf] %v1390_v15  ;;  %v1404_v22 = vld [vmem:[%s2485_s29 + $0x2c] sm:$0xf]  ;;  %v1406_v23 = vld [vmem:[%s2485_s29 + $0x30] sm:$0xf] }
 0x17e   : >> { %1393 = vst [vmem:[%s2481_s15 + $0x14] sm:$0xf] %v1392_v16  ;;  %v1408_v24 = vld [vmem:[%s2485_s29 + $0x34] sm:$0xf]  ;;  %v1410_v25 = vld [vmem:[%s2485_s29 + $0x38] sm:$0xf] }
 0x17f   : >> { %1395 = vst [vmem:[%s2481_s15 + $0x18] sm:$0xf] %v1394_v17  ;;  %v1412_v26 = vld [vmem:[%s2485_s29 + $0x3c] sm:$0xf]  ;;  %v1414_v27 = vld [vmem:[%s2485_s29 + $0x40] sm:$0xf] }
 0x180   : >> { %1397 = vst [vmem:[%s2481_s15 + $0x1c] sm:$0xf] %v1396_v18  ;;  %v1416_v28 = vld [vmem:[%s2485_s29 + $0x44] sm:$0xf]  ;;  %s2984_s9 = smov (%p1447_p12, %s1446_s9), 0  ;;  %s1376_s5 = sadd.s32 1, %s2493_s5  }
 0x181   : >> { %1399 = vst [vmem:[%s2481_s15 + $0x20] sm:$0xf] %v1398_v19  ;;  %v1418_v29 = vld [vmem:[%s2485_s29 + $0x48] sm:$0xf]  ;;  %v1420_v30 = vld [vmem:[%s2485_s29 + $0x4c] sm:$0xf]  ;;  %p1375_p3 = scmp.ge.s32.totalorder %s1376_s5, %s2820_s26  ;;  %s2971_s4 = smov %s2984_s9 }
 0x182   : >> { %1401 = vst [vmem:[%s2481_s15 + $0x24] sm:$0xf] %v1400_v20  ;;  %s1924_s12 = sshll.u32 %s2984_s9, 7  ;;  %v1422_v31 = vld [vmem:[%s2485_s29 + $0x50] sm:$0xf] }
 0x183   : >> { %1403 = vst [vmem:[%s2481_s15 + $0x28] sm:$0xf] %v1402_v21  ;;  %s2890_s10 = scalar_lea.vmem %s2715_s30, %s1924_s12 [#allocation7]   ;;  %s1452_s18 = scalar_lea.vmem %s2814_s8, %s1924_s12   ;;  %v1424_v32 = vld [vmem:[%s2485_s29 + $0x54] sm:$0xf]  ;;  %v1426_v33 = vld [vmem:[%s2485_s29 + $0x58] sm:$0xf] }
 0x184   : >> { %1405 = vst [vmem:[%s2481_s15 + $0x2c] sm:$0xf] %v1404_v22  ;;  %v1428_v34 = vld [vmem:[%s2485_s29 + $0x5c] sm:$0xf]  ;;  %v1430_v35 = vld [vmem:[%s2485_s29 + $0x60] sm:$0xf] }
 0x185   : >> { %1407 = vst [vmem:[%s2481_s15 + $0x30] sm:$0xf] %v1406_v23  ;;  %v1432_v36 = vld [vmem:[%s2485_s29 + $0x64] sm:$0xf]  ;;  %v1434_v37 = vld [vmem:[%s2485_s29 + $0x68] sm:$0xf] }
 0x186   : >> { %1409 = vst [vmem:[%s2481_s15 + $0x34] sm:$0xf] %v1408_v24  ;;  %v1436_v38 = vld [vmem:[%s2485_s29 + $0x6c] sm:$0xf]  ;;  %v1438_v39 = vld [vmem:[%s2485_s29 + $0x70] sm:$0xf] }
 0x187   : >> { %1411 = vst [vmem:[%s2481_s15 + $0x38] sm:$0xf] %v1410_v25  ;;  %v1440_v40 = vld [vmem:[%s2485_s29 + $0x74] sm:$0xf]  ;;  %v1442_v41 = vld [vmem:[%s2485_s29 + $0x78] sm:$0xf] }
 0x188   : >> { %1413 = vst [vmem:[%s2481_s15 + $0x3c] sm:$0xf] %v1412_v26  ;;  %v1444_v43 = vld [vmem:[%s2485_s29 + $0x7c] sm:$0xf]  ;;  %s2970_s29 = smov %s2890_s10 }
 0x189   : >> { %1415 = vst [vmem:[%s2481_s15 + $0x40] sm:$0xf] %v1414_v27 }
 0x18a   : >> { %1417 = vst [vmem:[%s2481_s15 + $0x44] sm:$0xf] %v1416_v28 }
 0x18b   : >> { %1419 = vst [vmem:[%s2481_s15 + $0x48] sm:$0xf] %v1418_v29 }
 0x18c   : >> { %1421 = vst [vmem:[%s2481_s15 + $0x4c] sm:$0xf] %v1420_v30 }
 0x18d   : >> { %1423 = vst [vmem:[%s2481_s15 + $0x50] sm:$0xf] %v1422_v31 }
 0x18e   : >> { %1425 = vst [vmem:[%s2481_s15 + $0x54] sm:$0xf] %v1424_v32 }
 0x18f   : >> { %1427 = vst [vmem:[%s2481_s15 + $0x58] sm:$0xf] %v1426_v33 }
 0x190   : >> { %1429 = vst [vmem:[%s2481_s15 + $0x5c] sm:$0xf] %v1428_v34 }
 0x191   : >> { %1431 = vst [vmem:[%s2481_s15 + $0x60] sm:$0xf] %v1430_v35 }
 0x192   : >> { %1433 = vst [vmem:[%s2481_s15 + $0x64] sm:$0xf] %v1432_v36 }
 0x193   : >> { %1435 = vst [vmem:[%s2481_s15 + $0x68] sm:$0xf] %v1434_v37 }
 0x194   : >> { %1437 = vst [vmem:[%s2481_s15 + $0x6c] sm:$0xf] %v1436_v38  ;;  %1378 = sbr.rel (!%p1375_p3) target bundleno = 376 (0x178), region = 144 }
 0x195   : >> { %1439 = vst [vmem:[%s2481_s15 + $0x70] sm:$0xf] %v1438_v39 }
 0x196   : >> { %1441 = vst [vmem:[%s2481_s15 + $0x74] sm:$0xf] %v1440_v40 }
 0x197   : >> { %1443 = vst [vmem:[%s2481_s15 + $0x78] sm:$0xf] %v1442_v41 }
 0x198   : >> { %1445 = vst [vmem:[%s2481_s15 + $0x7c] sm:$0xf] %v1444_v43  ;;  %s2969_s15 = smov %s1452_s18 }
 0x199 PF: > { %s2931_s20 = sand.u32 31, %s2982_s21   ;;  %s1976_s27 = sshll.u32 %s2820_s26, 7 }
 0x19a   : > { %s1457_s23 = scalar_lea.vmem %s2715_s30, %s1976_s27 [#allocation7]   ;;  %s1459_s24 = scalar_lea.vmem %s2814_s8, %s1976_s27  }
 0x19b   : > { %p1929_p6 = scmp.le.s32.totalorder %s2931_s20, 0 }
 0x19c   : > { %s2495_s11 = smov (!%p1929_p6), %s1459_s24   ;;  %s2499_s22 = smov (!%p1929_p6), %s1457_s23  }
 0x19d   : > { %1678 = sbr.rel (%p1929_p6) target bundleno = 426 (0x1aa), region = 149  ;;  %s2503_s6 = smov (!%p1929_p6), 0  }
 0x19e   : > { %s2507_s7 = smov (!%p1929_p6), 0  }
 0x1a2 LB: >> { %v1469_v44 = vld [vmem:[%s2501_s22] sm:$0xf]  ;;  %s1471_s21 = sadd.s32 1, %s2505_s6  ;;  %s1463_s7 = sadd.s32 1, %s2509_s7   ;;  %s2509_s7 = sphi %s2507_s7, %s1463_s7   ;;  %s2505_s6 = sphi %s2503_s6, %s2504_s6   ;;  %s2501_s22 = sphi %s2499_s22, %s1476_s22   ;;  %s2497_s11 = sphi %s2495_s11, %s1477_s11  }
 0x1a3   : >> { %1470 = vst [vmem:[%s2497_s11] sm:$0xf] %v1469_v44  ;;  %p1472_p7 = scmp.ge.s32.totalorder %s1471_s21, %s2931_s20  ;;  %p1462_p9 = scmp.ge.s32.totalorder %s1463_s7, %s2931_s20 }
 0x1a5   : >> { %s2986_s21 = smov (%p1472_p7, %s1471_s21), 0  ;;  %1465 = sbr.rel (!%p1462_p9) target bundleno = 418 (0x1a2), region = 155 }
 0x1a6   : >> { %s1930_s30 = sshll.u32 %s2986_s21, 2  ;;  %s2504_s6 = smov %s2986_s21  }
 0x1a7   : >> { %s1476_s22 = scalar_lea.vmem %s1457_s23, %s1930_s30 [#allocation7]   ;;  %s1477_s11 = scalar_lea.vmem %s1459_s24, %s1930_s30  }
 0x1aa PF: > { %s17_s17 = sadd.s32 1, %s2477_s17   ;;  %s2972_s12 = smov %s2461_s13 }
 0x1ab   : > { %p14_p11 = scmp.ge.s32.totalorder %s17_s17, 8   ;;  %s2973_s13 = smov %s2465_s14 }
 0x1ac   : > { %s2974_s14 = smov %s2592_s25  ;;  %s2975_s15 = smov %s2473_s16 }
 0x1ad   : > { %s2976_s16 = smov %s2978_s19  ;;  %16 = sbr.rel (!%p14_p11) target bundleno = 5 (0x5), region = 166 }
 0x1b2   :  { %1601 = vsyncpa [#allocation4], 1 }
 0x1b3   :  { %1603 = vsyncpa [#allocation4 + $0x1], 1 }
 0x1b4   :  { %1604 = vsyncpa [#allocation6], 1 }

</bundles_post_ra>
